<compile_context>
chip_gen: v7x
topology: tpu7x:2x2x1
jax: 0.10.0
libtpu: 0.0.40
codegen_flags: <defaults>
</compile_context>

<pallas_src>
import functools
import math

import jax
import jax.numpy as jnp
from jax import lax
from jax.experimental import pallas as pl
from jax.experimental.pallas import tpu as pltpu


def _round_up(x: int, m: int) -> int:
    return ((x + m - 1) // m) * m


def _dfc_kernel(x_ref, c_ref, csq_ref, o_ref, *, alpha: float, k_valid: int):
    x = x_ref[...].astype(jnp.float32)        # (TB, D)
    c = c_ref[...].astype(jnp.float32)        # (K_pad, D), resident across tiles
    c_sq = csq_ref[...]                        # (1, K_pad), precomputed in wrapper

    # ||x||^2 per row of this tile.
    x_sq = jnp.sum(x * x, axis=1, keepdims=True)                      # (TB, 1)

    # Cross term on the MXU; contract dim 1 of both (no c.T materialized).
    xc = lax.dot_general(
        x, c,
        dimension_numbers=(((1,), (1,)), ((), ())),
        preferred_element_type=jnp.float32,
    )                                                                  # (TB, K_pad)

    norm_sq = x_sq + c_sq - 2.0 * xc
    norm_sq = jnp.maximum(norm_sq, 0.0)  # guard tiny negatives from cancellation

    # 1 / (1 + d^2/alpha) == alpha / (alpha + d^2); /alpha folded away.
    numerator = alpha / (alpha + norm_sq)                              # (TB, K_pad)

    # Zero the padded cluster columns so they don't pollute the row sum.
    col = lax.broadcasted_iota(jnp.int32, numerator.shape, 1)
    numerator = jnp.where(col < k_valid, numerator, 0.0)

    denom = jnp.sum(numerator, axis=1, keepdims=True)                  # (TB, 1)
    # Exact reciprocal: approx=True would only hold sum-to-1 to ~1e-3/1e-4.
    inv_denom = pl.reciprocal(denom, approx=False)
    o_ref[...] = (numerator * inv_denom).astype(o_ref.dtype)


def dfc_forward(batch: jax.Array,
                cluster_centers: jax.Array,
                alpha: float = 1.0,
                tile_b: int = 256):
    """batch: [B, D], cluster_centers: [K, D] -> soft assignments [B, K] (f32)."""
    B, D = batch.shape
    K, D2 = cluster_centers.shape
    assert D == D2

    LANE, SUBLANE = 128, 8
    K_pad = _round_up(K, LANE)                 # lane-dense output
    TB = min(tile_b, _round_up(B, SUBLANE))    # batch tile (multiple of 8, <= tile_b)
    B_pad = _round_up(B, TB)

    x = batch.astype(jnp.float32)
    if B_pad != B:
        x = jnp.pad(x, ((0, B_pad - B), (0, 0)))
    c = cluster_centers.astype(jnp.float32)
    if K_pad != K:
        c = jnp.pad(c, ((0, K_pad - K), (0, 0)))
    # Hoisted centers squared norms (computed once, resident in VMEM).
    c_sq = jnp.sum(c * c, axis=1)[None, :]     # (1, K_pad)

    kernel = functools.partial(_dfc_kernel, alpha=float(alpha), k_valid=K)
    out = pl.pallas_call(
        kernel,
        out_shape=jax.ShapeDtypeStruct((B_pad, K_pad), jnp.float32),
        grid_spec=pltpu.PrefetchScalarGridSpec(
            num_scalar_prefetch=0,
            grid=(B_pad // TB,),
            in_specs=[
                pl.BlockSpec((TB, D), lambda i: (i, 0)),       # x: tiled over batch
                pl.BlockSpec((K_pad, D), lambda i: (0, 0)),    # centers: resident
                pl.BlockSpec((1, K_pad), lambda i: (0, 0)),    # c_sq: resident
            ],
            out_specs=pl.BlockSpec((TB, K_pad), lambda i: (i, 0)),
        ),
        compiler_params=pltpu.CompilerParams(
            dimension_semantics=("parallel",),      # shard batch tiles across TCs (v7x)
            vmem_limit_bytes=64 * 1024 * 1024,      # headroom for larger TB/D
        ),
    )(x, c, c_sq)
    return out[:B, :K]


def xavier_uniform(key, shape):
    # Matches nn.init.xavier_uniform_ for a 2-D tensor (fan_in=shape[1], fan_out=shape[0]).
    fan_out, fan_in = shape
    bound = math.sqrt(6.0 / (fan_in + fan_out))
    return jax.random.uniform(key, shape, dtype=jnp.float32, minval=-bound, maxval=bound)


def dfc_reference(batch, centers, alpha):
    # Direct (x - c)^2 formulation, like the PyTorch module.
    diff = batch[:, None, :] - centers[None, :, :]
    norm_sq = jnp.sum(diff * diff, axis=2)
    num = 1.0 / (1.0 + norm_sq / alpha)
    return num / jnp.sum(num, axis=1, keepdims=True)


if __name__ == "__main__":
    cluster_number = 4
    hidden_dimension = 32
    batch_size = 8
    alpha = 1.0

    key = jax.random.PRNGKey(0)
    k_centers, k_batch, k_big = jax.random.split(key, 3)

    # Deterministic Xavier-uniform init of cluster centers (as in the module __init__).
    cluster_centers = xavier_uniform(k_centers, (cluster_number, hidden_dimension))
    batch = jax.random.normal(k_batch, (batch_size, hidden_dimension), dtype=jnp.float32)

    out = dfc_forward(batch, cluster_centers, alpha)
    out = jax.block_until_ready(out)
    ref = dfc_reference(batch, cluster_centers, alpha)
    assert out.shape == (batch_size, cluster_number)
    assert jnp.allclose(out, ref, atol=1e-5, rtol=1e-5), "mismatch vs reference (small)"
    assert jnp.allclose(jnp.sum(out, axis=1), 1.0, atol=1e-5)

    # Second check exercising multi-tile grid + batch/cluster padding paths.
    big_batch = jax.random.normal(k_big, (300, hidden_dimension), dtype=jnp.float32)
    out_big = jax.block_until_ready(dfc_forward(big_batch, cluster_centers, alpha))
    ref_big = dfc_reference(big_batch, cluster_centers, alpha)
    assert out_big.shape == (300, cluster_number)
    assert jnp.allclose(out_big, ref_big, atol=1e-5, rtol=1e-5), "mismatch vs reference (big)"
    assert jnp.allclose(jnp.sum(out_big, axis=1), 1.0, atol=1e-5)

    print("KERNEL_OK")
</pallas_src>

<mosaic_0001>
module attributes {stable_mosaic.version = 11 : i64} {
  func.func @_dfc_kernel(%arg0: i32, %arg1: memref<8x32xf32, #tpu.memory_space<vmem>>, %arg2: memref<128x32xf32, #tpu.memory_space<vmem>>, %arg3: memref<1x128xf32, #tpu.memory_space<vmem>>, %arg4: memref<8x128xf32, #tpu.memory_space<vmem>>) attributes {dimension_semantics = [#tpu.dimension_semantics<parallel>], iteration_bounds = array<i64: 1>, scalar_prefetch = 0 : i64, scratch_operands = 0 : i64, tpu.core_type = #tpu.core_type<tc>, window_params = [{transform_indices = @transform_0, window_bounds = array<i64: 8, 32>}, {pipeline_mode = #tpu.pipeline_mode<synchronous>, transform_indices = @transform_1, window_bounds = array<i64: 128, 32>}, {pipeline_mode = #tpu.pipeline_mode<synchronous>, transform_indices = @transform_2, window_bounds = array<i64: 1, 128>}, {transform_indices = @transform_3, window_bounds = array<i64: 8, 128>}]} {
    %c0 = arith.constant 0 : index
    %c0_0 = arith.constant 0 : index
    %0 = vector.load %arg1[%c0, %c0_0] : memref<8x32xf32, #tpu.memory_space<vmem>>, vector<8x32xf32>
    %c0_1 = arith.constant 0 : index
    %c0_2 = arith.constant 0 : index
    %1 = vector.load %arg2[%c0_1, %c0_2] : memref<128x32xf32, #tpu.memory_space<vmem>>, vector<128x32xf32>
    %c0_3 = arith.constant 0 : index
    %c0_4 = arith.constant 0 : index
    %2 = vector.load %arg3[%c0_3, %c0_4] : memref<1x128xf32, #tpu.memory_space<vmem>>, vector<1x128xf32>
    %3 = arith.mulf %0, %0 : vector<8x32xf32>
    %cst = arith.constant dense<0.000000e+00> : vector<8xf32>
    %4 = vector.multi_reduction <add>, %3, %cst [1] : vector<8x32xf32> to vector<8xf32>
    %5 = vector.shape_cast %4 : vector<8xf32> to vector<8x1xf32>
    %cst_5 = arith.constant dense<0.000000e+00> : vector<8x128xf32>
    %6 = tpu.matmul %0, %1, %cst_5 {dimension_numbers = #tpu.dot_dimension_numbers<[1], [1], [0], [0], [0, 0, 1, 0], [], []>} : vector<8x32xf32>, vector<128x32xf32>, vector<8x128xf32> -> vector<8x128xf32>
    %7 = vector.broadcast %5 : vector<8x1xf32> to vector<8x128xf32>
    %8 = vector.broadcast %2 : vector<1x128xf32> to vector<8x128xf32>
    %9 = arith.addf %7, %8 : vector<8x128xf32>
    %cst_6 = arith.constant 2.000000e+00 : f32
    %10 = vector.broadcast %cst_6 : f32 to vector<8x128xf32>
    %11 = arith.mulf %10, %6 : vector<8x128xf32>
    %12 = arith.subf %9, %11 : vector<8x128xf32>
    %cst_7 = arith.constant 0.000000e+00 : f32
    %13 = vector.broadcast %cst_7 : f32 to vector<8x128xf32>
    %14 = arith.maximumf %12, %13 : vector<8x128xf32>
    %cst_8 = arith.constant 1.000000e+00 : f32
    %15 = vector.broadcast %cst_8 : f32 to vector<8x128xf32>
    %16 = arith.addf %15, %14 : vector<8x128xf32>
    %cst_9 = arith.constant 1.000000e+00 : f32
    %17 = vector.broadcast %cst_9 : f32 to vector<8x128xf32>
    %18 = arith.divf %17, %16 : vector<8x128xf32>
    %19 = tpu.iota {dimensions = array<i32: 1>} : vector<8x128xi32>
    %c4_i32 = arith.constant 4 : i32
    %20 = vector.broadcast %c4_i32 : i32 to vector<8x128xi32>
    %21 = arith.cmpi slt, %19, %20 : vector<8x128xi32>
    %cst_10 = arith.constant 0.000000e+00 : f32
    %22 = vector.broadcast %cst_10 : f32 to vector<8x128xf32>
    %23 = arith.select %21, %18, %22 : vector<8x128xi1>, vector<8x128xf32>
    %cst_11 = arith.constant dense<0.000000e+00> : vector<8xf32>
    %24 = vector.multi_reduction <add>, %23, %cst_11 [1] : vector<8x128xf32> to vector<8xf32>
    %25 = vector.shape_cast %24 : vector<8xf32> to vector<8x1xf32>
    %26 = tpu.reciprocal %25 : vector<8x1xf32> -> vector<8x1xf32>
    %27 = vector.broadcast %26 : vector<8x1xf32> to vector<8x128xf32>
    %28 = arith.mulf %23, %27 : vector<8x128xf32>
    %c0_12 = arith.constant 0 : index
    %c0_13 = arith.constant 0 : index
    %29 = vector.load %arg4[%c0_12, %c0_13] : memref<8x128xf32, #tpu.memory_space<vmem>>, vector<8x128xf32>
    tpu.vector_store %arg4[%c0_12, %c0_13], %28 {strides = array<i32>} : memref<8x128xf32, #tpu.memory_space<vmem>>, vector<8x128xf32>,
    return
  }
  func.func @transform_0(%arg0: i32) -> (i32, i32) {
    %c0_i32 = arith.constant 0 : i32
    %c0_i32_0 = arith.constant 0 : i32
    return %arg0, %c0_i32 : i32, i32
  }
  func.func @transform_1(%arg0: i32) -> (i32, i32) {
    %c0_i32 = arith.constant 0 : i32
    %c0_i32_0 = arith.constant 0 : i32
    %c0_i32_1 = arith.constant 0 : i32
    return %c0_i32, %c0_i32_0 : i32, i32
  }
  func.func @transform_2(%arg0: i32) -> (i32, i32) {
    %c0_i32 = arith.constant 0 : i32
    %c0_i32_0 = arith.constant 0 : i32
    %c0_i32_1 = arith.constant 0 : i32
    return %c0_i32, %c0_i32_0 : i32, i32
  }
  func.func @transform_3(%arg0: i32) -> (i32, i32) {
    %c0_i32 = arith.constant 0 : i32
    %c0_i32_0 = arith.constant 0 : i32
    return %arg0, %c0_i32 : i32, i32
  }
}

</mosaic_0001>

<bundles_post_ra>
// kernel: tpu_custom_call.1
= control target key start
LH: loop header
LB: loop body
LE: loop exit
PB: predicated region body
PF: predicated region fallthrough
CT: control target
= control target key end

     0   :  { %8 = vsyncpa [#allocation3], 0  ;;  %s544_s0 = inlined_call_operand.hbm [shape: f32[8,32], index: 0, kind: input, shape index: {}]   ;;  %s545_s1 = inlined_call_operand.hbm [shape: f32[128,32], index: 1, kind: input, shape index: {}]   ;;  %s546_s2 = inlined_call_operand.hbm [shape: f32[1,128], index: 2, kind: input, shape index: {}]   ;;  %s547_s3 = inlined_call_operand.hbm [shape: f32[8,128], index: 3, kind: output, shape index: {}]  }
   0x1   :  { %9 = vsyncpa [#allocation6], 0 }
   0x2   :  { %10 = vsyncpa [#allocation4], 0  ;;  %s443_s12 = smov [#allocation5]   ;;  %s349_s16 = scalar_lea.hbm %s545_s1, 2048 }
   0x3   :  { %s26_s13 = sshll.u32 %s443_s12, 4  ;;  %p350_p0 = scmp.ne.s32.totalorder %s545_s1, %s349_s16  ;;  %s27_s13 = int_to_ptr.vmem [resolvable:$true] %s26_s13 }
   0x4   :  { %p353_p1 = scmp.lt.u32.totalorder %s349_s16, %s545_s1 }
   0x6   :  { %p355_p2 = pnand %p353_p1, %p350_p0 }
   0x8   :  { %358 = shalt.err (!%p355_p2)
}
   0x9   :  { %s359_s21 = scalar_lea.vmem %s27_s13, 2048  ;;  %p364_p4 = scmp.lt.s32.totalorder %s27_s13, %s27_s13 }
   0xa   :  { %p360_p3 = scmp.ne.s32.totalorder %s27_s13, %s359_s21  ;;  %p365_p5 = scmp.lt.s32.totalorder %s359_s21, %s359_s21 }
   0xc   :  { %p366_p6 = por %p365_p5, %p364_p4 }
   0xe   :  { %p367_p7 = pnand %p366_p6, %p360_p3 }
  0x10   :  { %370 = shalt.err (!%p367_p7)
}
  0x11   :  { %s444_s22 = smov 128   ;;  %s445_s23 = smov 8  }
  0x12   :  { %32 = dma.hbm_to_vmem [thread:$0]  %s545_s1, 2048, %s27_s13, [#allocation6], %s444_s22, %s444_s22, %s445_s23  }
  0x13   :  { %s446_s26 = smov [#allocation2]   ;;  %s447_s28 = smov [#allocation7]  }
  0x14   :  { %s17_s27 = sshll.u32 %s446_s26, 4  ;;  %s39_s29 = sshll.u32 %s447_s28, 4  ;;  %s18_s27 = int_to_ptr.vmem [resolvable:$true] %s17_s27  ;;  %s40_s29 = int_to_ptr.vmem [resolvable:$true] %s39_s29 }
  0x15   :  { %s371_s5 = scalar_lea.hbm %s544_s0, 128 }
  0x16   :  { %p372_p8 = scmp.ne.s32.totalorder %s544_s0, %s371_s5  ;;  %p375_p9 = scmp.lt.u32.totalorder %s371_s5, %s544_s0 }
  0x18   :  { %p377_p10 = pnand %p375_p9, %p372_p8 }
  0x1a   :  { %380 = shalt.err (!%p377_p10)
}
  0x1b   :  { %s381_s1 = scalar_lea.vmem %s18_s27, 128  ;;  %p386_p12 = scmp.lt.s32.totalorder %s18_s27, %s18_s27 }
  0x1c   :  { %p382_p11 = scmp.ne.s32.totalorder %s18_s27, %s381_s1  ;;  %p387_p13 = scmp.lt.s32.totalorder %s381_s1, %s381_s1 }
  0x1e   :  { %p388_p0 = por %p387_p13, %p386_p12 }
  0x20   :  { %p389_p1 = pnand %p388_p0, %p382_p11 }
  0x22   :  { %392 = shalt.err (!%p389_p1)
}
  0x23   :  { %20 = dma.hbm_to_vmem [thread:$0]  %s544_s0, 128, %s18_s27, [#allocation3]  }
  0x24   :  { %s393_s14 = scalar_lea.hbm %s546_s2, 16 }
  0x25   :  { %p394_p2 = scmp.ne.s32.totalorder %s546_s2, %s393_s14  ;;  %p397_p3 = scmp.lt.u32.totalorder %s393_s14, %s546_s2 }
  0x27   :  { %p399_p4 = pnand %p397_p3, %p394_p2 }
  0x29   :  { %402 = shalt.err (!%p399_p4)
}
  0x2a   :  { %s403_s19 = scalar_lea.vmem %s40_s29, 16  ;;  %s407_s20 = scalar_lea.vmem %s40_s29, 32 }
  0x2b   :  { %p404_p5 = scmp.ne.s32.totalorder %s40_s29, %s403_s19  ;;  %p408_p6 = scmp.lt.s32.totalorder %s40_s29, %s40_s29 }
  0x2c   :  { %p409_p7 = scmp.lt.s32.totalorder %s407_s20, %s403_s19 }
  0x2e   :  { %p410_p8 = por %p409_p7, %p408_p6 }
  0x30   :  { %p411_p9 = pnand %p410_p8, %p404_p5 }
  0x32   :  { %414 = shalt.err (!%p411_p9)
}
  0x33   :  { %42 = dma.hbm_to_vmem [thread:$0]  %s546_s2, 16, %s40_s29, [#allocation6]  }
  0x34   :  { %437 = dma.done.wait [#allocation3], 128  }
  0x35   :  { %438 = vsyncadd [#allocation3], 4294967168 }
  0x36   :  { %439 = dma.done.wait [#allocation6], 2064  }
  0x37   :  { %440 = vsyncadd [#allocation6], 4294965232  ;;  %v448_v0 = vmov 0.0|0.0   ;;  %vm449_vm0 = vmmov 0   ;;  %v450_v1 = vmov 0.0   ;;  %vm71_vm1 = vcmask 261120  }
  0x38   :  { %304 = vmatprep.subr.bf16.mxu0 %v448_v0  ;;  %301 = vmatprep.mubr.msk.f32.mxu0 %vm449_vm0, %v450_v1  ;;  %v53_v2 = vld [vmem:[#allocation5] sm:$0xff]  ;;  %v54_v3 = vld [vmem:[#allocation5 + $0x8] sm:$0xff]  ;;  %vm510_vm2 = vmpackc.low %vm71_vm1, %vm71_vm1  ;;  %v209_v39 = vlaneseq  ;;  %s451_s2 = smov [#allocation8]  }
  0x39   :  { %v305_v5 = vpack.c.bf16 %v54_v3, %v53_v2  ;;  %v55_v6 = vld [vmem:[#allocation5 + $0x10] sm:$0xff]  ;;  %v56_v7 = vld [vmem:[#allocation5 + $0x18] sm:$0xff]  ;;  %v57_v12 = vld [vmem:[#allocation5 + $0x20] sm:$0xff]  ;;  %s224_s22 = sshll.u32 %s451_s2, 4  ;;  %s225_s22 = int_to_ptr.vmem [resolvable:$true] %s224_s22 }
  0x3a   :  { %v52_v8 = vld [vmem:[#allocation2] sm:$0xff]  ;;  %v309_v10 = vpack.c.bf16 %v56_v7, %v55_v6  ;;  %v58_v13 = vld [vmem:[#allocation5 + $0x28] sm:$0xff]  ;;  %v59_v15 = vld [vmem:[#allocation5 + $0x30] sm:$0xff]  ;;  %v210_v40 = vand.u32 127, %v209_v39  ;;  %s415_s23 = scalar_lea.vmem %s225_s22, 128  ;;  %p420_p11 = scmp.lt.s32.totalorder %s225_s22, %s225_s22 }
  0x3b   :  { %307 = vmatpush3.bf16.xpose.msk.msra.mxu0 %vm510_vm2, %v305_v5  ;;  %v70_v9 = vmul.f32 %v52_v8, %v52_v8  ;;  %v313_v14 = vpack.c.bf16 %v58_v13, %v57_v12  ;;  %v60_v16 = vld [vmem:[#allocation5 + $0x38] sm:$0xff]  ;;  %v61_v18 = vld [vmem:[#allocation5 + $0x40] sm:$0xff]  ;;  %v62_v19 = vld [vmem:[#allocation5 + $0x48] sm:$0xff]  ;;  %p416_p10 = scmp.ne.s32.totalorder %s225_s22, %s415_s23  ;;  %p421_p12 = scmp.lt.s32.totalorder %s415_s23, %s415_s23 }
  0x3c   :  { %308 = vmatprep.subr.bf16.mxu0 %v448_v0  ;;  %v317_v17 = vpack.c.bf16 %v60_v16, %v59_v15  ;;  %v321_v20 = vpack.c.bf16 %v62_v19, %v61_v18  ;;  %v63_v21 = vld [vmem:[#allocation5 + $0x50] sm:$0xff]  ;;  %v64_v22 = vld [vmem:[#allocation5 + $0x58] sm:$0xff]  ;;  %v65_v24 = vld [vmem:[#allocation5 + $0x60] sm:$0xff]  ;;  %vm211_vm3 = vcmp.lt.s32.totalorder %v210_v40, 4 }
  0x3d   :  { %v72_v11 = vsel %vm71_vm1, %v70_v9, 0.0  ;;  %v325_v23 = vpack.c.bf16 %v64_v22, %v63_v21  ;;  %v66_v25 = vld [vmem:[#allocation5 + $0x68] sm:$0xff]  ;;  %v67_v27 = vld [vmem:[#allocation5 + $0x70] sm:$0xff]  ;;  %v68_v28 = vld [vmem:[#allocation5 + $0x78] sm:$0xff]  ;;  %p422_p13 = por %p421_p12, %p420_p11 }
  0x3e   :  { %73 = vadd.xlane.f32.xlu0 %v72_v11  ;;  %v329_v26 = vpack.c.bf16 %v66_v25, %v65_v24  ;;  %v333_v29 = vpack.c.bf16 %v68_v28, %v67_v27  ;;  %v251_v30 = vld [vmem:[#allocation7] ss:$0 sm:$0xff] }
  0x3f   :  { %p423_p0 = pnand %p422_p13, %p416_p10 }
  0x43   :  { %311 = vmatpush3.bf16.xpose.msk.msra.mxu0 %vm510_vm2, %v309_v10 }
  0x44   :  { %312 = vmatprep.subr.bf16.mxu0 %v448_v0 }
  0x4b   :  { %315 = vmatpush3.bf16.xpose.msk.msra.mxu0 %vm510_vm2, %v313_v14 }
  0x4c   :  { %316 = vmatprep.subr.bf16.mxu0 %v448_v0 }
  0x53   :  { %319 = vmatpush3.bf16.xpose.msk.msra.mxu0 %vm510_vm2, %v317_v17 }
  0x54   :  { %320 = vmatprep.subr.bf16.mxu0 %v448_v0 }
  0x5b   :  { %323 = vmatpush3.bf16.xpose.msk.msra.mxu0 %vm510_vm2, %v321_v20 }
  0x5c   :  { %324 = vmatprep.subr.bf16.mxu0 %v448_v0 }
  0x63   :  { %327 = vmatpush3.bf16.xpose.msk.msra.mxu0 %vm510_vm2, %v325_v23 }
  0x64   :  { %328 = vmatprep.subr.bf16.mxu0 %v448_v0 }
  0x6b   :  { %331 = vmatpush3.bf16.xpose.msk.msra.mxu0 %vm510_vm2, %v329_v26 }
  0x6c   :  { %332 = vmatprep.subr.bf16.mxu0 %v448_v0 }
  0x73   :  { %335 = vmatpush3.bf16.xpose.msk.msra.mxu0 %vm510_vm2, %v333_v29 }
  0x7a   :  { %302 = vmatmul.mubr.msk.f32.vlgmr.msra.gmra.mrb[0].mxu0 %vm71_vm1, %v52_v8 }
  0xcb   :  { %v74_v31 = vpop.xlane.xlu0 %73 }
  0xcc   :  { %v202_v32 = vadd.f32 %v251_v30, %v74_v31 }
 0x14d   :  { %v192_v33 = vpop.f32.mrb[0].mxu0 }
 0x14e   :  { %v203_v34 = vmul.f32 2.0, %v192_v33  ;;  %v303_v35 = vpop.f32.mrb[1].mxu0 }
 0x150   :  { %v204_v36 = vsub.f32 %v202_v32, %v203_v34 }
 0x152   :  { %v205_v37 = vmax.f32 %v204_v36, 0.0 }
 0x154   :  { %v206_v38 = vadd.f32 1.0, %v205_v37 }
 0x156   :  { %345 = vrcp.f32 %v206_v38 }
 0x160   :  { %v346_v41 = vpop.eup %345 }
 0x161   :  { %v212_v42 = vsel %vm211_vm3, %v346_v41, 0.0 }
 0x162   :  { %213 = vadd.xlane.f32.xlu0 %v212_v42 }
 0x1ef   :  { %v214_v43 = vpop.xlane.xlu0 %213 }
 0x1f0   :  { %347 = vrcp.f32 %v214_v43 }
 0x1fa   :  { %v348_v44 = vpop.eup %347 }
 0x1fb   :  { %v216_v45 = vmul.f32 %v348_v44, %v212_v42 }
 0x1fd   :  { %217 = vst [vmem:[#allocation8] sm:$0xff] %v216_v45 }
 0x1fe   :  { %426 = shalt.err (!%p423_p0)
}
 0x1ff   :  { %s427_s26 = scalar_lea.hbm %s547_s3, 128 }
 0x200   :  { %p428_p1 = scmp.ne.s32.totalorder %s547_s3, %s427_s26  ;;  %p431_p2 = scmp.lt.u32.totalorder %s427_s26, %s547_s3 }
 0x202   :  { %p433_p3 = pnand %p431_p2, %p428_p1 }
 0x204   :  { %436 = shalt.err (!%p433_p3)
}
 0x205   :  { %227 = dma.vmem_to_hbm [thread:$0]  %s225_s22, 128, %s547_s3, [#allocation4]  }
 0x206   :  { %441 = dma.done.wait [#allocation4], 128  }
 0x207   :  { %442 = vsyncadd [#allocation4], 4294967168 }
 0x208   :  { %231 = vsyncpa [#allocation3], 1 }
 0x209   :  { %232 = vsyncpa [#allocation6], 1 }
 0x20a   :  { %233 = vsyncpa [#allocation4], 1 }

</bundles_post_ra>
